<compile_context>
chip_gen: v6e
topology: v6e:2x2x1
jax: 0.10.0
libtpu: 0.0.40
codegen_flags: <defaults>
</compile_context>

<pallas_src>
import math

import jax
import jax.numpy as jnp
import numpy as np
from jax.experimental import pallas as pl
from jax.experimental.pallas import tpu as pltpu

MLP_IN_DIM = 25
MLP_DIM = 32
_TAIL_RING = 4          # broadcast-tail DMAs kept in flight per batch

_C0 = 1.0 / (2.0 * math.sqrt(math.pi))
_C1 = math.sqrt(3.0) * _C0
_C2 = math.sqrt(15.0) * _C0
_C3 = math.sqrt(1.25) * _C0


# --------------------------------------------------------------------------- #
# SH basis + 25->32 Linear + ReLU in plain JAX (per perf review: the op makes
# only N*32 floats, so a dedicated pallas_call would be pure overhead).
# --------------------------------------------------------------------------- #
def _sh_basis(v):
    x, y, z = v[:, 0], v[:, 1], v[:, 2]
    return jnp.stack(
        [jnp.full_like(x, _C0), y * _C1, z * _C1, x * _C1,
         x * y * _C2, y * z * _C2, (3.0 * z * z - 1.0) * _C3,
         z * x * _C2, (x * x - z * z) * _C2], axis=-1)


def sh_pose_mlp(pose, old_pose, ext, old_ext, w_t, b):
    sh = _sh_basis(pose[:, :3])
    mlp_in = jnp.concatenate(
        [sh, pose, pose - old_pose, ext[:, :2] - old_ext[:, :2], ext[:, :2]],
        axis=-1)                                          # (N, 25)
    return jax.nn.relu(mlp_in @ w_t + b)                  # (N, 32)


# --------------------------------------------------------------------------- #
# Kernel 1: cache = cat(inference_features, repeat(mlp_out, H, W), dim=1)
# Grid = (batch,).  Per batch: one contiguous HBM->HBM feature DMA, one scratch
# fill, then a ring of tail DMAs with skewed waits.
# --------------------------------------------------------------------------- #
def _pick_tail_tile(hw, max_tile):
    """Lane tile for the broadcast tail: <= max_tile, multiple of 128 when
    tiling is needed.  Returns (tile, num_full_tiles, remainder_lanes)."""
    max_tile = max(128, (int(max_tile) // 128) * 128)
    if hw <= max_tile:
        return hw, 1, 0
    num_full = hw // max_tile
    rem = hw - num_full * max_tile
    return max_tile, num_full, rem


def _make_cache_kernel(cf, hw, tile, num_full, rem, ring):
    def kernel(mlp_ref, feat_hbm, out_hbm, tail_vmem, sems):
        b = pl.program_id(0)

        # (1) Feature half: ONE contiguous (cf, hw) HBM -> HBM DMA per batch.
        feat_cp = pltpu.make_async_copy(
            feat_hbm.at[b],
            out_hbm.at[b, pl.ds(0, cf), pl.ds(0, hw)],
            sems.at[ring + 1])
        feat_cp.start()

        # (2) Fill the lane-dense broadcast scratch ONCE per batch.
        tail_vmem[...] = jnp.broadcast_to(mlp_ref[0], (MLP_DIM, tile))

        def tail_copy(s, slot):
            return pltpu.make_async_copy(
                tail_vmem,
                out_hbm.at[b, pl.ds(cf, MLP_DIM), pl.ds(s * tile, tile)],
                sems.at[slot])

        # (3) Broadcast tail: statically unrolled ring of in-flight DMAs,
        #     waits skewed `ring` steps behind the starts.
        # TODO(synk): for extremely large H*W (num_full >> 64) switch this
        # static unroll to a pl.loop with lax.rem-indexed semaphore slots.
        for s in range(num_full):
            slot = s % ring
            if s >= ring:
                tail_copy(s - ring, slot).wait()
            tail_copy(s, slot).start()

        if rem:
            # Ragged tail: one more full-width copy starting at hw - tile.
            # It overlaps already-written columns with identical broadcast
            # values (harmless) and avoids a partial-lane VMEM read.
            rem_cp = pltpu.make_async_copy(
                tail_vmem,
                out_hbm.at[b, pl.ds(cf, MLP_DIM), pl.ds(hw - tile, tile)],
                sems.at[ring])
            rem_cp.start()

        # (4) Drain.
        for s in range(max(num_full - ring, 0), num_full):
            tail_copy(s, s % ring).wait()
        if rem:
            rem_cp.wait()
        feat_cp.wait()

    return kernel


def build_cache(features, mlp_out, *, max_spatial_tile=32768, ring=_TAIL_RING):
    n, cf, h, w = features.shape
    hw = h * w
    dtype = features.dtype
    tile, num_full, rem = _pick_tail_tile(hw, max_spatial_tile)

    feat_flat = features.reshape(n, cf, hw)               # free, contiguous
    mlp_col = mlp_out.astype(dtype).reshape(n, MLP_DIM, 1)

    cache_flat = pl.pallas_call(
        _make_cache_kernel(cf, hw, tile, num_full, rem, ring),
        out_shape=jax.ShapeDtypeStruct((n, cf + MLP_DIM, hw), dtype),
        grid=(n,),
        in_specs=[
            pl.BlockSpec((1, MLP_DIM, 1), lambda b: (b, 0, 0)),
            pl.BlockSpec(memory_space=pl.ANY),             # raw HBM features
        ],
        out_specs=pl.BlockSpec(memory_space=pl.ANY),       # raw HBM cache
        scratch_shapes=[
            pltpu.VMEM((MLP_DIM, tile), dtype),            # <= 4 MiB
            pltpu.SemaphoreType.DMA((ring + 2,)),          # ring + rem + feat
        ],
        compiler_params=pltpu.CompilerParams(
            dimension_semantics=("parallel",),             # batches are self-contained
            vmem_limit_bytes=32 * 1024 * 1024,
        ),
    )(mlp_col, feat_flat)
    return cache_flat.reshape(n, cf + MLP_DIM, h, w)


# --------------------------------------------------------------------------- #
# Kernel 2: predict_mask head.  rgb = y2[:, 0:3] stays a plain XLA slice; the
# Pallas kernel touches only the mask channel, reshaped (N, HW/128, 128) so
# blocks are sublane-dense (1, 8k, 128) with unmasked stores.
# --------------------------------------------------------------------------- #
def _pick_row_tile(rows, cap=512):
    if rows <= 8:
        return rows
    r = min(cap, rows)
    r -= r % 8
    while r >= 8:
        if rows % r == 0:
            return r
        r -= 8
    return rows                        # no multiple-of-8 divisor: full extent


def _mask_sigmoid_kernel(x_ref, o_ref):
    x = x_ref[...].astype(jnp.float32)
    z = jnp.exp(-jnp.abs(x))           # numerically stable sigmoid
    sig = jnp.where(x >= 0, 1.0 / (1.0 + z), z / (1.0 + z))
    o_ref[...] = sig.astype(o_ref.dtype)


def predict_mask_head(y2):
    n, c, h, w = y2.shape
    hw = h * w
    rgb = y2[:, 0:3]                                       # XLA slice only
    if hw % 128 != 0:
        # TODO(synk): spatial extents not divisible by 128 fall back to the
        # XLA sigmoid (no lane-dense reshape available without padding).
        return rgb, jax.nn.sigmoid(y2[:, 3:4])

    rows = hw // 128
    rt = _pick_row_tile(rows)
    m_in = y2[:, 3].reshape(n, rows, 128)
    m_out = pl.pallas_call(
        _mask_sigmoid_kernel,
        out_shape=jax.ShapeDtypeStruct((n, rows, 128), y2.dtype),
        grid=(n, rows // rt),
        in_specs=[pl.BlockSpec((1, rt, 128), lambda b, s: (b, s, 0))],
        out_specs=pl.BlockSpec((1, rt, 128), lambda b, s: (b, s, 0)),
        compiler_params=pltpu.CompilerParams(
            dimension_semantics=("parallel", "parallel")),
    )(m_in)
    return rgb, m_out.reshape(n, 1, h, w)


# --------------------------------------------------------------------------- #
# Wrapper mirroring InferencePipeLine.forward
# --------------------------------------------------------------------------- #
def inference_pipeline_forward(params, state, inputs):
    pose = inputs["pose"]
    extrinsics = inputs["extrinsics"]
    mlp_out = sh_pose_mlp(pose, state["pose"], extrinsics, state["extrinsics"],
                          params["mlp_w_t"], params["mlp_b"])
    cache = build_cache(state["inference_features"], mlp_out)
    # TODO(synk): NeuralWarp_Mask (self.warpnet), UNet_Mask and Texture are
    # external modules whose code is not part of the reference source, so the
    # warp/decode producing y2 cannot be reproduced; we return `cache` (the
    # exact tensor the reference feeds to warpnet) and expose the predict_mask
    # head separately.
    return cache, mlp_out


# --------------------------------------------------------------------------- #
# Pure-JAX references for correctness checking
# --------------------------------------------------------------------------- #
def _cache_ref(feats, mlp_out):
    n, cf, h, w = feats.shape
    spatial = jnp.broadcast_to(mlp_out[:, :, None, None], (n, MLP_DIM, h, w))
    return jnp.concatenate([feats, spatial.astype(feats.dtype)], axis=1)


def _forward_ref(params, state, inputs):
    pose = inputs["pose"]
    ext = inputs["extrinsics"]
    sh = _sh_basis(pose[:, :3])
    mlp_in = jnp.concatenate(
        [sh, pose, pose - state["pose"],
         ext[:, :2] - state["extrinsics"][:, :2], ext[:, :2]], axis=-1)
    mlp_out = jax.nn.relu(mlp_in @ params["mlp_w_t"] + params["mlp_b"])
    return _cache_ref(state["inference_features"], mlp_out), mlp_out


if __name__ == "__main__":
    key = jax.random.PRNGKey(0)
    keys = jax.random.split(key, 16)

    # batch, cached feature channels (unet.cache_dim stand-in), spatial
    N, CF, H, W = 2, 16, 16, 16

    params = {
        "mlp_w_t": jax.random.normal(keys[0], (MLP_IN_DIM, MLP_DIM), jnp.float32) * 0.1,
        "mlp_b": jax.random.normal(keys[1], (MLP_DIM,), jnp.float32) * 0.1,
    }
    state = {
        "inference_features": jax.random.normal(keys[2], (N, CF, H, W), jnp.float32),
        "pose": jax.random.normal(keys[3], (N, 6), jnp.float32),
        "extrinsics": jax.random.normal(keys[4], (N, 3), jnp.float32),
    }
    inputs = {
        "uv_map": jax.random.uniform(keys[5], (N, H, W, 2), jnp.float32),
        "pose": jax.random.normal(keys[6], (N, 6), jnp.float32),
        "extrinsics": jax.random.normal(keys[7], (N, 3), jnp.float32),
    }

    cache, mlp_out = inference_pipeline_forward(params, state, inputs)
    jax.block_until_ready((cache, mlp_out))
    cache_ref, mlp_ref = _forward_ref(params, state, inputs)
    np.testing.assert_allclose(np.asarray(mlp_out), np.asarray(mlp_ref),
                               rtol=1e-4, atol=1e-4)
    np.testing.assert_allclose(np.asarray(cache), np.asarray(cache_ref),
                               rtol=1e-5, atol=1e-5)

    # Multi-tile + ragged-remainder path (hw=576, tile=256 -> 2 full + rem 64).
    feats2 = jax.random.normal(keys[9], (N, 8, 16, 36), jnp.float32)
    mlp2 = jax.random.normal(keys[10], (N, MLP_DIM), jnp.float32)
    cache2 = build_cache(feats2, mlp2, max_spatial_tile=256)
    jax.block_until_ready(cache2)
    np.testing.assert_allclose(np.asarray(cache2),
                               np.asarray(_cache_ref(feats2, mlp2)),
                               rtol=1e-5, atol=1e-5)

    # Ring rollover path (hw=1536, tile=256 -> 6 full tiles > ring of 4).
    feats3 = jax.random.normal(keys[11], (N, 8, 24, 64), jnp.float32)
    mlp3 = jax.random.normal(keys[12], (N, MLP_DIM), jnp.float32)
    cache3 = build_cache(feats3, mlp3, max_spatial_tile=256)
    jax.block_until_ready(cache3)
    np.testing.assert_allclose(np.asarray(cache3),
                               np.asarray(_cache_ref(feats3, mlp3)),
                               rtol=1e-5, atol=1e-5)

    # predict_mask head (y2 would be produced by the external warpnet).
    def _check_mask_head(y2_arr):
        rgb, mask = predict_mask_head(y2_arr)
        jax.block_until_ready((rgb, mask))
        np.testing.assert_allclose(np.asarray(rgb), np.asarray(y2_arr[:, 0:3]),
                                   rtol=1e-5, atol=1e-5)
        mref = 1.0 / (1.0 + np.exp(-np.asarray(y2_arr[:, 3:4], dtype=np.float64)))
        np.testing.assert_allclose(np.asarray(mask), mref, rtol=1e-5, atol=1e-5)

    _check_mask_head(jax.random.normal(keys[8], (N, 4, H, W), jnp.float32))
    _check_mask_head(jax.random.normal(keys[13], (N, 4, 32, 32), jnp.float32))
    _check_mask_head(jax.random.normal(keys[14], (N, 4, 10, 10), jnp.float32))  # XLA fallback

    print("KERNEL_OK")
</pallas_src>

<mosaic_0001>
module attributes {stable_mosaic.version = 11 : i64} {
  func.func @kernel(%arg0: i32, %arg1: memref<1x32x1xf32, #tpu.memory_space<vmem>>, %arg2: memref<2x16x256xf32, #tpu.memory_space<any>>, %arg3: memref<2x48x256xf32, #tpu.memory_space<any>>, %arg4: memref<32x256xf32, #tpu.memory_space<vmem>>, %arg5: memref<6x!tpu.dma_semaphore, #tpu.memory_space<semaphore_mem>>) attributes {dimension_semantics = [#tpu.dimension_semantics<parallel>], iteration_bounds = array<i64: 2>, scalar_prefetch = 0 : i64, scratch_operands = 2 : i64, tpu.core_type = #tpu.core_type<tc>, window_params = [{transform_indices = @transform_0, window_bounds = array<i64: 1, 32, 1>}, {}, {}]} {
    %c5_i32 = arith.constant 5 : i32
    %c0_i32 = arith.constant 0 : i32
    %c0_i32_0 = arith.constant 0 : i32
    %0 = tpu.memref_slice %arg2[%arg0, %c0_i32, %c0_i32_0] : memref<2x16x256xf32, #tpu.memory_space<any>> -> memref<1x16x256xf32, #tpu.memory_space<any>>
    %1 = tpu.memref_squeeze %0 : memref<1x16x256xf32, #tpu.memory_space<any>> -> memref<16x256xf32, #tpu.memory_space<any>>
    %c0_i32_1 = arith.constant 0 : i32
    %c0_i32_2 = arith.constant 0 : i32
    %2 = tpu.memref_slice %arg3[%arg0, %c0_i32_1, %c0_i32_2] : memref<2x48x256xf32, #tpu.memory_space<any>> -> memref<1x16x256xf32, #tpu.memory_space<any>>
    %3 = tpu.memref_squeeze %2 : memref<1x16x256xf32, #tpu.memory_space<any>> -> memref<16x256xf32, #tpu.memory_space<any>>
    %4 = tpu.memref_slice %arg5[%c5_i32] : memref<6x!tpu.dma_semaphore, #tpu.memory_space<semaphore_mem>> -> memref<1x!tpu.dma_semaphore, #tpu.memory_space<semaphore_mem>>
    %5 = tpu.memref_squeeze %4 : memref<1x!tpu.dma_semaphore, #tpu.memory_space<semaphore_mem>> -> memref<!tpu.dma_semaphore, #tpu.memory_space<semaphore_mem>>
    tpu.enqueue_dma source(%1 : memref<16x256xf32, #tpu.memory_space<any>>) target(%3 : memref<16x256xf32, #tpu.memory_space<any>>) target_semaphore(%5 : memref<!tpu.dma_semaphore, #tpu.memory_space<semaphore_mem>>)
    %c0 = arith.constant 0 : index
    %c0_3 = arith.constant 0 : index
    %c0_4 = arith.constant 0 : index
    %6 = vector.load %arg1[%c0, %c0_3, %c0_4] : memref<1x32x1xf32, #tpu.memory_space<vmem>>, vector<1x32x1xf32>
    %7 = vector.shape_cast %6 : vector<1x32x1xf32> to vector<32x1xf32>
    %8 = vector.shape_cast %7 : vector<32x1xf32> to vector<32x1xf32>
    %9 = vector.broadcast %8 : vector<32x1xf32> to vector<32x256xf32>
    %c0_5 = arith.constant 0 : index
    %c0_6 = arith.constant 0 : index
    %10 = vector.load %arg4[%c0_5, %c0_6] : memref<32x256xf32, #tpu.memory_space<vmem>>, vector<32x256xf32>
    tpu.vector_store %arg4[%c0_5, %c0_6], %9 {strides = array<i32>} : memref<32x256xf32, #tpu.memory_space<vmem>>, vector<32x256xf32>,
    %c0_i32_7 = arith.constant 0 : i32
    %c16_i32 = arith.constant 16 : i32
    %c0_i32_8 = arith.constant 0 : i32
    %11 = tpu.memref_slice %arg3[%arg0, %c16_i32, %c0_i32_8] : memref<2x48x256xf32, #tpu.memory_space<any>> -> memref<1x32x256xf32, #tpu.memory_space<any>>
    %12 = tpu.memref_squeeze %11 : memref<1x32x256xf32, #tpu.memory_space<any>> -> memref<32x256xf32, #tpu.memory_space<any>>
    %13 = tpu.memref_slice %arg5[%c0_i32_7] : memref<6x!tpu.dma_semaphore, #tpu.memory_space<semaphore_mem>> -> memref<1x!tpu.dma_semaphore, #tpu.memory_space<semaphore_mem>>
    %14 = tpu.memref_squeeze %13 : memref<1x!tpu.dma_semaphore, #tpu.memory_space<semaphore_mem>> -> memref<!tpu.dma_semaphore, #tpu.memory_space<semaphore_mem>>
    tpu.enqueue_dma source(%arg4 : memref<32x256xf32, #tpu.memory_space<vmem>>) target(%12 : memref<32x256xf32, #tpu.memory_space<any>>) target_semaphore(%14 : memref<!tpu.dma_semaphore, #tpu.memory_space<semaphore_mem>>)
    %c0_i32_9 = arith.constant 0 : i32
    %c16_i32_10 = arith.constant 16 : i32
    %c0_i32_11 = arith.constant 0 : i32
    %15 = tpu.memref_slice %arg3[%arg0, %c16_i32_10, %c0_i32_11] : memref<2x48x256xf32, #tpu.memory_space<any>> -> memref<1x32x256xf32, #tpu.memory_space<any>>
    %16 = tpu.memref_squeeze %15 : memref<1x32x256xf32, #tpu.memory_space<any>> -> memref<32x256xf32, #tpu.memory_space<any>>
    %17 = tpu.memref_slice %arg5[%c0_i32_9] : memref<6x!tpu.dma_semaphore, #tpu.memory_space<semaphore_mem>> -> memref<1x!tpu.dma_semaphore, #tpu.memory_space<semaphore_mem>>
    %18 = tpu.memref_squeeze %17 : memref<1x!tpu.dma_semaphore, #tpu.memory_space<semaphore_mem>> -> memref<!tpu.dma_semaphore, #tpu.memory_space<semaphore_mem>>
    tpu.wait_dma2 semaphore(%18 : memref<!tpu.dma_semaphore, #tpu.memory_space<semaphore_mem>>) src(%arg4 : memref<32x256xf32, #tpu.memory_space<vmem>>) dst(%16 : memref<32x256xf32, #tpu.memory_space<any>>)
    %c5_i32_12 = arith.constant 5 : i32
    %c0_i32_13 = arith.constant 0 : i32
    %c0_i32_14 = arith.constant 0 : i32
    %19 = tpu.memref_slice %arg2[%arg0, %c0_i32_13, %c0_i32_14] : memref<2x16x256xf32, #tpu.memory_space<any>> -> memref<1x16x256xf32, #tpu.memory_space<any>>
    %20 = tpu.memref_squeeze %19 : memref<1x16x256xf32, #tpu.memory_space<any>> -> memref<16x256xf32, #tpu.memory_space<any>>
    %c0_i32_15 = arith.constant 0 : i32
    %c0_i32_16 = arith.constant 0 : i32
    %21 = tpu.memref_slice %arg3[%arg0, %c0_i32_15, %c0_i32_16] : memref<2x48x256xf32, #tpu.memory_space<any>> -> memref<1x16x256xf32, #tpu.memory_space<any>>
    %22 = tpu.memref_squeeze %21 : memref<1x16x256xf32, #tpu.memory_space<any>> -> memref<16x256xf32, #tpu.memory_space<any>>
    %23 = tpu.memref_slice %arg5[%c5_i32_12] : memref<6x!tpu.dma_semaphore, #tpu.memory_space<semaphore_mem>> -> memref<1x!tpu.dma_semaphore, #tpu.memory_space<semaphore_mem>>
    %24 = tpu.memref_squeeze %23 : memref<1x!tpu.dma_semaphore, #tpu.memory_space<semaphore_mem>> -> memref<!tpu.dma_semaphore, #tpu.memory_space<semaphore_mem>>
    tpu.wait_dma2 semaphore(%24 : memref<!tpu.dma_semaphore, #tpu.memory_space<semaphore_mem>>) src(%20 : memref<16x256xf32, #tpu.memory_space<any>>) dst(%22 : memref<16x256xf32, #tpu.memory_space<any>>)
    return
  }
  func.func @transform_0(%arg0: i32) -> (i32, i32, i32) {
    %c0_i32 = arith.constant 0 : i32
    %c0_i32_0 = arith.constant 0 : i32
    %c0_i32_1 = arith.constant 0 : i32
    return %arg0, %c0_i32, %c0_i32_0 : i32, i32, i32
  }
}

</mosaic_0001>

<bundles_post_ra>
// kernel: tpu_custom_call.1
= control target key start
LH: loop header
LB: loop body
LE: loop exit
PB: predicated region body
PF: predicated region fallthrough
CT: control target
= control target key end

     0   :  { %s313_s9 = smov 0   ;;  %s366_s0 = inlined_call_operand.vmem [shape: f32[2,32,1], index: 0, kind: input, shape index: {}]   ;;  %s367_s1 = inlined_call_operand.vmem [shape: f32[2,16,256], index: 1, kind: input, shape index: {}]   ;;  %s368_s2 = inlined_call_operand.hbm [shape: f32[2,48,256], index: 2, kind: output, shape index: {}]  }
   0x1 LB: > { %s206_s10 = sadd.s32 4294967295, %s294_s9   ;;  %p211_p0 = scmp.lt.s32.totalorder %s294_s9, 1  ;;  %s294_s9 = sphi %s313_s9, %s12_s9  }
   0x2   : > { %p63_p1 = scmp.lt.s32.totalorder (!%p211_p0), %s206_s10, 1  ;;  %s225_s12 = sshll.u32 (!%p211_p0), %s206_s10, 5 }
   0x3   : > { %54 = sbr.rel (%p211_p0) target bundleno = 165 (0xa5), region = 24  ;;  %s70_s16 = scalar_lea.vmem (!%p211_p0), %s367_s1, %s225_s12 }
   0x4   : > { %s226_s20 = smul.u32 (!%p211_p0), 1536, %s206_s10  ;;  %s82_s21 = sshll.u32 (!%p211_p0), %s70_s16, 4  ;;  %s83_s21 = int_to_ptr.vmem [resolvable:$true] %s82_s21 }
   0x5   : > { %s239_s25 = scalar_lea.vmem (!%p211_p0), %s83_s21, 512  ;;  %s241_s28 = sshll.u32 (!%p211_p0), %s367_s1, 4  ;;  %s242_s28 = int_to_ptr.vmem [resolvable:$false] %s241_s28 }
   0x6   : > { %s329_s24 = scalar_lea.hbm (!%p211_p0), %s368_s2, %s226_s20  ;;  %p240_p2 = scmp.ne.s32.totalorder (!%p211_p0), %s83_s21, %s239_s25 }
   0x7   : > { %s243_s29 = scalar_lea.vmem (!%p211_p0), %s242_s28, 1024  ;;  %p244_p3 = scmp.lt.s32.totalorder (!%p211_p0), %s83_s21, %s242_s28 }
   0x8   : > { %v296_v0 = vmov 0   ;;  %s64_s11 = scalar_select %p63_p1, %s206_s10, 1 }
   0x9   : > { %238 = vset.pattern.permute.xlu1 %v296_v0  ;;  %237 = vset.pattern.permute.xlu0 %v296_v0  ;;  %p245_p4 = scmp.lt.s32.totalorder %s243_s29, %s239_s25 }
   0xa   : > { %s224_s13 = sshll.u32 %s64_s11, 5 }
   0xb   : > { %s67_s19 = scalar_lea.vmem %s366_s0, %s224_s13  ;;  %p246_p5 = por %p245_p4, %p244_p3 }
   0xc   : > { %v88_v1 = vld [vmem:[%s67_s19 + $0x10] sm:$0xff]  ;;  %v86_v2 = vld [vmem:[%s67_s19] sm:$0xff]  ;;  %v89_v3 = vld [vmem:[%s67_s19 + $0x18] sm:$0xff] }
   0xd   : > { %102 = vperm.xlu1 %238, %v88_v1   ;;  %92 = vperm.xlu0 %237, %v86_v2   ;;  %v87_v4 = vld [vmem:[%s67_s19 + $0x8] sm:$0xff]  ;;  %p247_p6 = pnand %p246_p5, %p240_p2 }
   0xf   : > { %250 = shalt.err (!%p247_p6)  }
  0x10   : > { %s335_s30 = scalar_lea.hbm %s329_s24, 512  ;;  %s253_s5 = scalar_lea.hbm %s368_s2, 3072 }
  0x11   : > { %p252_p7 = scmp.ne.s32.totalorder %s329_s24, %s335_s30  ;;  %p254_p8 = scmp.lt.s32.totalorder %s329_s24, %s368_s2 }
  0x12   : > { %p255_p9 = scmp.lt.s32.totalorder %s253_s5, %s335_s30 }
  0x14   : > { %p256_p10 = por %p255_p9, %p254_p8 }
  0x16   : > { %p257_p11 = pnand %p256_p10, %p252_p7 }
  0x18   : > { %260 = shalt.err (!%p257_p11)  }
  0x19   : > { %85 = dma.vmem_to_hbm [thread:$0]  %s83_s21, 512, %s329_s24, [#allocation3 + $0x5]  ;;  %107 = vperm.xlu1 %238, %v89_v3   ;;  %97 = vperm.xlu0 %237, %v87_v4  }
  0x1a   : > { %s297_s11 = smov [#allocation2]  }
  0x1b   : > { %s128_s12 = sshll.u32 %s297_s11, 4  ;;  %s129_s12 = int_to_ptr.vmem [resolvable:$true] %s128_s12 }
  0x1c   : > { %s261_s13 = scalar_lea.vmem %s129_s12, 1024  ;;  %p266_p13 = scmp.lt.s32.totalorder %s129_s12, %s129_s12 }
  0x1d   : > { %p262_p12 = scmp.ne.s32.totalorder %s129_s12, %s261_s13  ;;  %p267_p0 = scmp.lt.s32.totalorder %s261_s13, %s261_s13 }
  0x1f   : > { %p268_p1 = por %p267_p0, %p266_p13 }
  0x21   : > { %p269_p2 = pnand %p268_p1, %p262_p12 }
  0x88   : > { %v103_v5 = vpop.permute.xlu1 %102  ;;  %v93_v6 = vpop.permute.xlu0 %92 }
  0x89   : > { %114 = vst [vmem:[#allocation2 + $0x20] sm:$0xff] %v103_v5  ;;  %115 = vst [vmem:[#allocation2 + $0x28] sm:$0xff] %v103_v5 }
  0x8a   : > { %110 = vst [vmem:[#allocation2] sm:$0xff] %v93_v6  ;;  %111 = vst [vmem:[#allocation2 + $0x8] sm:$0xff] %v93_v6 }
  0x94   : > { %v108_v7 = vpop.permute.xlu1 %107  ;;  %v98_v8 = vpop.permute.xlu0 %97 }
  0x95   : > { %116 = vst [vmem:[#allocation2 + $0x30] sm:$0xff] %v108_v7  ;;  %117 = vst [vmem:[#allocation2 + $0x38] sm:$0xff] %v108_v7 }
  0x96   : > { %112 = vst [vmem:[#allocation2 + $0x10] sm:$0xff] %v98_v8  ;;  %113 = vst [vmem:[#allocation2 + $0x18] sm:$0xff] %v98_v8 }
  0x97   : > { %272 = shalt.err (!%p269_p2)  }
  0x98   : > { %s283_s14 = scalar_lea.hbm %s329_s24, 1536  ;;  %p276_p4 = scmp.lt.s32.totalorder %s335_s30, %s368_s2 }
  0x99   : > { %p274_p3 = scmp.ne.s32.totalorder %s335_s30, %s283_s14  ;;  %p277_p5 = scmp.lt.s32.totalorder %s253_s5, %s283_s14 }
  0x9b   : > { %p278_p6 = por %p277_p5, %p276_p4 }
  0x9d   : > { %p279_p7 = pnand %p278_p6, %p274_p3 }
  0x9f   : > { %282 = shalt.err (!%p279_p7)  }
  0xa0   : > { %131 = dma.vmem_to_hbm [thread:$0]  %s129_s12, 1024, %s335_s30, [#allocation3] }
  0xa1   : > { %288 = dma.done.wait [#allocation3], 1024 }
  0xa2   : > { %289 = vsyncadd [#allocation3], 4294966272 }
  0xa3   : > { %290 = dma.done.wait [#allocation3 + $0x5], 512 }
  0xa4   : > { %291 = vsyncadd [#allocation3 + $0x5], 4294966784 }
  0xa5 PF: > { %s12_s9 = sadd.s32 1, %s294_s9  }
  0xa6   : > { %p9_p8 = scmp.ge.s32.totalorder %s12_s9, 3  }
  0xa8   :  { %11 = sbr.rel (!%p9_p8) target bundleno = 1 (0x1), region = 55 }
  0xad   :  { %140 = vsyncmov [#allocation3] }
  0xb0   :  { %s141_s19 = vpop.sfrf %140 }
  0xb1   :  { %p218_p9 = scmp.ne.s32.totalorder %s141_s19, 0 }
  0xb3   :  { %145 = shalt.err (%p218_p9)  }
  0xb4   :  { %147 = vsyncmov [#allocation3 + $0x1] }
  0xb7   :  { %s148_s20 = vpop.sfrf %147 }
  0xb8   :  { %p219_p10 = scmp.ne.s32.totalorder %s148_s20, 0 }
  0xba   :  { %152 = shalt.err (%p219_p10)  }
  0xbb   :  { %154 = vsyncmov [#allocation3 + $0x2] }
  0xbe   :  { %s155_s21 = vpop.sfrf %154 }
  0xbf   :  { %p220_p11 = scmp.ne.s32.totalorder %s155_s21, 0 }
  0xc1   :  { %159 = shalt.err (%p220_p11)  }
  0xc2   :  { %161 = vsyncmov [#allocation3 + $0x3] }
  0xc5   :  { %s162_s22 = vpop.sfrf %161 }
  0xc6   :  { %p221_p12 = scmp.ne.s32.totalorder %s162_s22, 0 }
  0xc8   :  { %166 = shalt.err (%p221_p12)  }
  0xc9   :  { %168 = vsyncmov [#allocation3 + $0x4] }
  0xcc   :  { %s169_s23 = vpop.sfrf %168 }
  0xcd   :  { %p222_p13 = scmp.ne.s32.totalorder %s169_s23, 0 }
  0xcf   :  { %173 = shalt.err (%p222_p13)  }
  0xd0   :  { %175 = vsyncmov [#allocation3 + $0x5] }
  0xd3   :  { %s176_s0 = vpop.sfrf %175 }
  0xd4   :  { %p223_p0 = scmp.ne.s32.totalorder %s176_s0, 0 }
  0xd6   :  { %180 = shalt.err (%p223_p0)  }

</bundles_post_ra>
